<compile_context>
chip_gen: v6e
topology: v6e:2x2x1
jax: 0.10.0
libtpu: 0.0.40
codegen_flags: <defaults>
</compile_context>

<pallas_src>
import math

import jax
import jax.numpy as jnp
from jax.experimental import pallas as pl
from jax.experimental.pallas import tpu as pltpu


def _pos_enc_kernel(x_ref, pe_ref, o_ref):
    # x_ref / o_ref: (TILE_B, TILE_C); pe_ref: (1, TILE_C).
    # Pure VPU add with a sublane broadcast of pe — HBM bandwidth bound.
    o_ref[...] = x_ref[...] + pe_ref[...]


def make_pe_buffer(d_model: int, max_len: int, dtype=jnp.float32) -> jnp.ndarray:
    """Sinusoidal positional-encoding table (max_len, d_model), built once in
    the model dtype (angles computed in f32 for accuracy)."""
    position = jnp.arange(0, max_len, dtype=jnp.float32)[:, None]              # (max_len, 1)
    div_term = jnp.exp(
        jnp.arange(0, d_model, 2, dtype=jnp.float32) * (-math.log(10000.0)) / d_model
    )                                                                           # (ceil(d/2),)
    angles = position * div_term                                                # (max_len, ceil(d/2))
    pe = jnp.zeros((max_len, d_model), dtype=jnp.float32)
    pe = pe.at[:, 0::2].set(jnp.sin(angles))
    # Guard odd d_model: cos slots number floor(d/2) (the PyTorch reference
    # shape-errors for odd d_model; here the extra column is simply dropped).
    pe = pe.at[:, 1::2].set(jnp.cos(angles)[:, : d_model // 2])
    return pe.astype(dtype)


def _sublane_multiple(dtype) -> int:
    # (8, 128) vreg tiling: 8 sublanes for 4-byte, 16 for 2-byte, 32 for 1-byte.
    itemsize = jnp.dtype(dtype).itemsize
    return max(8, 32 // max(1, itemsize))


def _choose_tiles(rows: int, cols: int, dtype, target_bytes: int):
    """Pick (tile_b, tile_c) for the flattened (rows=batch, cols=seq*d) view so
    one block is ~target_bytes, with sublane/lane-aligned (or full-extent) dims."""
    itemsize = jnp.dtype(dtype).itemsize
    mult = _sublane_multiple(dtype)
    if rows * cols * itemsize <= target_bytes:
        return rows, cols                                   # single block
    if rows <= mult:
        tile_b = rows                                       # full extent (always legal)
    else:
        full_rows = (target_bytes // (cols * itemsize)) // mult * mult
        tile_b = int(min(rows, max(mult, full_rows)))       # sublane multiple
    tile_c = (target_bytes // (tile_b * itemsize)) // 128 * 128
    tile_c = int(min(cols, max(128, tile_c)))               # lane multiple or full
    return int(tile_b), tile_c


def positional_encoding(x: jnp.ndarray, pe: jnp.ndarray, *,
                        target_block_bytes: int = 4 << 20,
                        donate_x: bool = False) -> jnp.ndarray:
    """x: (batch, seq, d_model); pe: (max_len, d_model).
    Returns x + pe[:seq] (eval-mode dropout = identity)."""
    batch, seq, d = x.shape
    if pe.dtype != x.dtype:
        # Prefer building pe directly in the model dtype at init; this is a fallback.
        pe = pe.astype(x.dtype)

    # Flatten (seq, d) into one trailing axis -> lane-dense blocks for any d_model.
    cols = seq * d
    x2 = x.reshape(batch, cols)                 # layout-preserving reshape
    pe2 = pe[:seq, :].reshape(1, cols)

    tile_b, tile_c = _choose_tiles(batch, cols, x.dtype, target_block_bytes)
    num_b = pl.cdiv(batch, tile_b)
    num_c = pl.cdiv(cols, tile_c)

    if num_c == 1:
        # One column tile: pe block index is constant; 1-D row grid so the
        # single "parallel" axis carries all the extent (v7x: both TCs busy).
        grid = (num_b,)
        x_spec = pl.BlockSpec((tile_b, tile_c), lambda b: (b, 0))
        pe_spec = pl.BlockSpec((1, tile_c), lambda b: (0, 0))
        dims = ("parallel",)
    else:
        # Column tiles outermost, batch-row tiles innermost: pe's block index
        # depends only on the outer axis, so it stays resident across the
        # inner loop; leading parallel axis has extent >= 2.
        grid = (num_c, num_b)
        x_spec = pl.BlockSpec((tile_b, tile_c), lambda c, b: (b, c))
        pe_spec = pl.BlockSpec((1, tile_c), lambda c, b: (0, c))
        dims = ("parallel", "parallel")

    itemsize = jnp.dtype(x.dtype).itemsize
    x_blk = tile_b * tile_c * itemsize
    pe_blk = tile_c * itemsize
    # x + out double-buffered, pe double-buffered; never request > 48 MiB
    # (v7x has 64 MiB VMEM per TC).
    vmem_needed = 2 * (2 * x_blk + pe_blk)
    vmem_limit = int(min(48 << 20, max(16 << 20, 2 * vmem_needed)))

    out2 = pl.pallas_call(
        _pos_enc_kernel,
        out_shape=jax.ShapeDtypeStruct((batch, cols), x.dtype),
        grid_spec=pltpu.PrefetchScalarGridSpec(
            num_scalar_prefetch=0,
            grid=grid,
            in_specs=[x_spec, pe_spec],
            out_specs=x_spec,
        ),
        compiler_params=pltpu.CompilerParams(
            dimension_semantics=dims,
            vmem_limit_bytes=vmem_limit,
        ),
        # TODO(synk): the only remaining big lever is fusing this add into the
        # adjacent embedding / first-layer kernel; standalone x+pe is 100%
        # HBM-bound regardless of tiling.
        input_output_aliases={0: 0} if donate_x else {},
    )(x2, pe2)
    return out2.reshape(batch, seq, d)


if __name__ == "__main__":
    # 1) Small demo shape (single-block path).
    batch, seq, d_model, max_len = 2, 8, 32, 64
    x = jax.random.normal(jax.random.PRNGKey(0), (batch, seq, d_model), dtype=jnp.float32)
    pe = make_pe_buffer(d_model, max_len, dtype=x.dtype)
    out = positional_encoding(x, pe)
    jax.block_until_ready(out)
    ref = x + pe[:seq, :][None, :, :]
    assert out.shape == x.shape
    assert jnp.allclose(out, ref, atol=1e-6), "mismatch vs reference (single-block path)"

    # 2) 2-D (col-tile, row-tile) grid path with partial edge blocks in both
    #    dims and d_model not a multiple of 128 (lane density via flattening).
    b2, s2, d2, ml2 = 10, 8, 72, 32
    x2 = jax.random.normal(jax.random.PRNGKey(1), (b2, s2, d2), dtype=jnp.float32)
    pe2 = make_pe_buffer(d2, ml2, dtype=x2.dtype)
    out2 = positional_encoding(x2, pe2, target_block_bytes=2048)   # grid = (5, 2)
    jax.block_until_ready(out2)
    ref2 = x2 + pe2[:s2, :][None, :, :]
    assert jnp.allclose(out2, ref2, atol=1e-6), "mismatch vs reference (2-D tiled path)"

    # 3) 1-D batch-row grid path (full fused columns per block, pe fully resident).
    b3, s3, d3, ml3 = 64, 8, 32, 16
    x3 = jax.random.normal(jax.random.PRNGKey(2), (b3, s3, d3), dtype=jnp.float32)
    pe3 = make_pe_buffer(d3, ml3, dtype=x3.dtype)
    out3 = positional_encoding(x3, pe3, target_block_bytes=8192)   # grid = (8,)
    jax.block_until_ready(out3)
    ref3 = x3 + pe3[:s3, :][None, :, :]
    assert jnp.allclose(out3, ref3, atol=1e-6), "mismatch vs reference (row-grid path)"

    print("KERNEL_OK")
</pallas_src>

<mosaic_0001>
module attributes {stable_mosaic.version = 11 : i64} {
  func.func @_pos_enc_kernel(%arg0: i32, %arg1: memref<2x256xf32, #tpu.memory_space<vmem>>, %arg2: memref<1x256xf32, #tpu.memory_space<vmem>>, %arg3: memref<2x256xf32, #tpu.memory_space<vmem>>) attributes {dimension_semantics = [#tpu.dimension_semantics<parallel>], iteration_bounds = array<i64: 1>, scalar_prefetch = 0 : i64, scratch_operands = 0 : i64, tpu.core_type = #tpu.core_type<tc>, window_params = [{transform_indices = @transform_0, window_bounds = array<i64: 2, 256>}, {pipeline_mode = #tpu.pipeline_mode<synchronous>, transform_indices = @transform_1, window_bounds = array<i64: 1, 256>}, {transform_indices = @transform_2, window_bounds = array<i64: 2, 256>}]} {
    %c0 = arith.constant 0 : index
    %c0_0 = arith.constant 0 : index
    %0 = vector.load %arg1[%c0, %c0_0] : memref<2x256xf32, #tpu.memory_space<vmem>>, vector<2x256xf32>
    %c0_1 = arith.constant 0 : index
    %c0_2 = arith.constant 0 : index
    %1 = vector.load %arg2[%c0_1, %c0_2] : memref<1x256xf32, #tpu.memory_space<vmem>>, vector<1x256xf32>
    %2 = vector.broadcast %1 : vector<1x256xf32> to vector<2x256xf32>
    %3 = arith.addf %0, %2 : vector<2x256xf32>
    %c0_3 = arith.constant 0 : index
    %c0_4 = arith.constant 0 : index
    %4 = vector.load %arg3[%c0_3, %c0_4] : memref<2x256xf32, #tpu.memory_space<vmem>>, vector<2x256xf32>
    tpu.vector_store %arg3[%c0_3, %c0_4], %3 {strides = array<i32>} : memref<2x256xf32, #tpu.memory_space<vmem>>, vector<2x256xf32>,
    return
  }
  func.func @transform_0(%arg0: i32) -> (i32, i32) {
    %c0_i32 = arith.constant 0 : i32
    %c0_i32_0 = arith.constant 0 : i32
    return %arg0, %c0_i32 : i32, i32
  }
  func.func @transform_1(%arg0: i32) -> (i32, i32) {
    %c0_i32 = arith.constant 0 : i32
    %c0_i32_0 = arith.constant 0 : i32
    %c0_i32_1 = arith.constant 0 : i32
    return %c0_i32, %c0_i32_0 : i32, i32
  }
  func.func @transform_2(%arg0: i32) -> (i32, i32) {
    %c0_i32 = arith.constant 0 : i32
    %c0_i32_0 = arith.constant 0 : i32
    return %arg0, %c0_i32 : i32, i32
  }
}

</mosaic_0001>

<bundles_post_ra>
// kernel: tpu_custom_call.1
= control target key start
LH: loop header
LB: loop body
LE: loop exit
PB: predicated region body
PF: predicated region fallthrough
CT: control target
= control target key end

     0   :  { %7 = vsyncpa [#allocation3], 0  ;;  %s172_s0 = inlined_call_operand.hbm [shape: f32[2,256], index: 0, kind: input, shape index: {}]   ;;  %s173_s1 = inlined_call_operand.hbm [shape: f32[1,256], index: 1, kind: input, shape index: {}]   ;;  %s174_s2 = inlined_call_operand.hbm [shape: f32[2,256], index: 2, kind: output, shape index: {}]  }
   0x1   :  { %8 = vsyncpa [#allocation6], 0 }
   0x2   :  { %9 = vsyncpa [#allocation4], 0  ;;  %s144_s9 = smov [#allocation2]   ;;  %s145_s11 = smov [#allocation5]  }
   0x3   :  { %s16_s10 = sshll.u32 %s144_s9, 4  ;;  %s26_s12 = sshll.u32 %s145_s11, 4  ;;  %s17_s10 = int_to_ptr.vmem [resolvable:$true] %s16_s10  ;;  %s27_s12 = int_to_ptr.vmem [resolvable:$true] %s26_s12 }
   0x4   :  { %s86_s13 = scalar_lea.vmem %s17_s10, 64  ;;  %p91_p1 = scmp.lt.s32.totalorder %s17_s10, %s17_s10 }
   0x5   :  { %p87_p0 = scmp.ne.s32.totalorder %s17_s10, %s86_s13  ;;  %p92_p2 = scmp.lt.s32.totalorder %s86_s13, %s86_s13 }
   0x7   :  { %p93_p3 = por %p92_p2, %p91_p1 }
   0x9   :  { %p94_p4 = pnand %p93_p3, %p87_p0 }
   0xb   :  { %97 = shalt.err (!%p94_p4)
}
   0xc   :  { %19 = dma.hbm_to_vmem [thread:$0]  %s172_s0, 64, %s17_s10, [#allocation3]  }
   0xd   :  { %s106_s16 = scalar_lea.vmem %s27_s12, 32  ;;  %p111_p6 = scmp.lt.s32.totalorder %s27_s12, %s27_s12 }
   0xe   :  { %p107_p5 = scmp.ne.s32.totalorder %s27_s12, %s106_s16  ;;  %p112_p7 = scmp.lt.s32.totalorder %s106_s16, %s106_s16 }
  0x10   :  { %p113_p8 = por %p112_p7, %p111_p6 }
  0x12   :  { %p114_p9 = pnand %p113_p8, %p107_p5 }
  0x14   :  { %117 = shalt.err (!%p114_p9)
}
  0x15   :  { %29 = dma.hbm_to_vmem [thread:$0]  %s173_s1, 32, %s27_s12, [#allocation6]  }
  0x16   :  { %138 = dma.done.wait [#allocation3], 64  }
  0x17   :  { %139 = vsyncadd [#allocation3], 4294967232 }
  0x18   :  { %140 = dma.done.wait [#allocation6], 32  }
  0x19   :  { %141 = vsyncadd [#allocation6], 4294967264  ;;  %v39_v0 = vlaneseq  ;;  %v146_v1 = vmov 1983009808   ;;  %v37_v7 = vld [vmem:[#allocation5] sm:$0x3] }
  0x1a   :  { %v49_v2 = vunpack.c.l.s4 %v146_v1  ;;  %v36_v12 = vld [vmem:[#allocation2] sm:$0xf]  ;;  %s147_s0 = smov [#allocation7]  }
  0x1b   :  { %v40_v3 = vshrl.u32 %v39_v0, 7  ;;  %s64_s19 = sshll.u32 %s147_s0, 4  ;;  %s65_s19 = int_to_ptr.vmem [resolvable:$true] %s64_s19 }
  0x1c   :  { %v50_v6 = vunpack.c.0.s8 %v49_v2  ;;  %s118_s1 = scalar_lea.vmem %s65_s19, 64  ;;  %p123_p11 = scmp.lt.s32.totalorder %s65_s19, %s65_s19 }
  0x1d   :  { %v41_v4 = vsub.s32 0, %v40_v3  ;;  %v45_v5 = vsub.s32 1, %v40_v3  ;;  %p119_p10 = scmp.ne.s32.totalorder %s65_s19, %s118_s1  ;;  %p124_p12 = scmp.lt.s32.totalorder %s118_s1, %s118_s1 }
  0x1e   :  { %v53_v10 = vsub.s32 %v50_v6, %v40_v3 }
  0x1f   :  { %v42_v8 = vrot.slane %v37_v7, %v41_v4  ;;  %v46_v9 = vrot.slane %v37_v7, %v45_v5  ;;  %p125_p13 = por %p124_p12, %p123_p11 }
  0x21   :  { %v47_v11 = vcombine.low %v42_v8, %v46_v9  ;;  %p126_p0 = pnand %p125_p13, %p119_p10 }
  0x23   :  { %v54_v13 = vrot.slane %v47_v11, %v53_v10 }
  0x25   :  { %v56_v14 = vadd.f32 %v54_v13, %v36_v12 }
  0x27   :  { %57 = vst [vmem:[#allocation7] sm:$0xf] %v56_v14 }
  0x28   :  { %129 = shalt.err (!%p126_p0)
}
  0x29   :  { %67 = dma.vmem_to_hbm [thread:$0]  %s65_s19, 64, %s174_s2, [#allocation4]  }
  0x2a   :  { %142 = dma.done.wait [#allocation4], 64  }
  0x2b   :  { %143 = vsyncadd [#allocation4], 4294967232 }
  0x2c   :  { %71 = vsyncpa [#allocation3], 1 }
  0x2d   :  { %72 = vsyncpa [#allocation6], 1 }
  0x2e   :  { %73 = vsyncpa [#allocation4], 1 }

</bundles_post_ra>
